<compile_context>
chip_gen: v5e
topology: v5e:2x2
jax: 0.10.0
libtpu: 0.0.40
codegen_flags: <defaults>
</compile_context>

<pallas_src>
import functools
import math

import jax
import jax.numpy as jnp
from jax.experimental import pallas as pl
from jax.experimental.pallas import tpu as pltpu


# ----------------------------- helpers -----------------------------
def _round_up(x, m):
    return (x + m - 1) // m * m


def _tpu_vmem_capacity_bytes(default=64 * 1024 * 1024):
    """Physical VMEM per TensorCore; guarded so it can never break compilation."""
    try:
        info = pltpu.get_tpu_info()
        for attr in ("vmem_capacity_bytes", "vmem_size_bytes", "vmem_bytes"):
            cap = getattr(info, attr, None)
            if cap:
                return int(cap)
    except Exception:
        pass
    return default


def _const_spec(arr, grid_rank, single_buffer):
    """BlockSpec for an operand whose block index never changes (weights, LN params)."""
    zeros = (0,) * arr.ndim
    index_map = {2: (lambda i, j: zeros), 3: (lambda i, j, k: zeros)}[grid_rank]
    if single_buffer:
        return pl.BlockSpec(arr.shape, index_map, pipeline_mode=pl.Buffered(1))
    return pl.BlockSpec(arr.shape, index_map)


# ----------------------------- Stage 1: QKV projections -----------------------------
def _qkv_proj_kernel(x_ref, wq_ref, bq_ref, wk_ref, bk_ref, wv_ref, bv_ref,
                     q_ref, k_ref, v_ref, *, q_scale):
    x = x_ref[0]                                                   # (TS, H) bf16
    q = jnp.dot(x, wq_ref[...], preferred_element_type=jnp.float32) + bq_ref[...]
    k = jnp.dot(x, wk_ref[...], preferred_element_type=jnp.float32) + bk_ref[...]
    v = jnp.dot(x, wv_ref[...], preferred_element_type=jnp.float32) + bv_ref[...]
    q_ref[0] = (q * q_scale).astype(jnp.bfloat16)                  # pre-scaled queries
    k_ref[0] = k.astype(jnp.bfloat16)
    v_ref[0] = v.astype(jnp.bfloat16)


# ----------------------------- Stage 2: flash attention + output -----------------------------
def _flash_attn_kernel(q_ref, k_ref, v_ref, *rest,
                       num_bias, has_mask, num_heads, head_dim, bias_scale, eps):
    bias_refs = rest[:num_bias]
    idx = num_bias
    mask_ref = rest[idx] if has_mask else None
    idx += 1 if has_mask else 0
    (hid_ref, wo_ref, bo_ref, lng_ref, lnb_ref,
     out_ref, m_ref, l_ref, acc_ref) = rest[idx:]

    ki = pl.program_id(2)

    @pl.when(ki == 0)
    def _init():
        m_ref[...] = jnp.full_like(m_ref, -jnp.inf)
        l_ref[...] = jnp.zeros_like(l_ref)
        acc_ref[...] = jnp.zeros_like(acc_ref)

    q = q_ref[0]                                                   # (NH, TQ, DH) bf16
    k = k_ref[0]                                                   # (NH, TK, DH) bf16
    v = v_ref[0]                                                   # (NH, TK, DH) bf16

    # scores = (q/sqrt(d)) @ k^T [+ (rel_pos + rel_2d_pos)/sqrt(d)] [+ attention_mask]
    s = jnp.einsum('hqd,hkd->hqk', q, k, preferred_element_type=jnp.float32)
    if num_bias:
        b = bias_refs[0][0].astype(jnp.float32)
        for br in bias_refs[1:]:
            b = b + br[0].astype(jnp.float32)
        s = s + b * bias_scale
    if has_mask:
        s = s + mask_ref[0, 0].astype(jnp.float32)                 # (1, TK) broadcast

    # Online softmax (exact-math equivalent of the CogView PB-Relax softmax).
    m_prev = m_ref[...]
    m_new = jnp.maximum(m_prev, jnp.max(s, axis=-1, keepdims=True))
    alpha = jnp.exp(m_prev - m_new)
    p = jnp.exp(s - m_new)
    l_ref[...] = alpha * l_ref[...] + jnp.sum(p, axis=-1, keepdims=True)
    acc_ref[...] = alpha * acc_ref[...] + jnp.einsum(
        'hqk,hkd->hqd', p.astype(jnp.bfloat16), v, preferred_element_type=jnp.float32)
    m_ref[...] = m_new

    @pl.when(ki == pl.num_programs(2) - 1)
    def _finalize():
        inv_l = pl.reciprocal(l_ref[...], approx=True)             # (NH, TQ, 1)
        # RobertaSelfOutput: dense + residual + LayerNorm.  The dense is accumulated
        # per head to avoid an in-kernel head-merge relayout (once per query tile).
        y = hid_ref[0].astype(jnp.float32) + bo_ref[...]
        for h in range(num_heads):
            ctx_h = (acc_ref[h] * inv_l[h]).astype(jnp.bfloat16)   # (TQ, DH)
            w_h = wo_ref[h * head_dim:(h + 1) * head_dim, :]       # (DH, H)
            y = y + jnp.dot(ctx_h, w_h, preferred_element_type=jnp.float32)
        mu = jnp.mean(y, axis=-1, keepdims=True)
        var = jnp.mean((y - mu) * (y - mu), axis=-1, keepdims=True)
        y = (y - mu) * jax.lax.rsqrt(var + eps) * lng_ref[...] + lnb_ref[...]
        out_ref[0] = y.astype(out_ref.dtype)


# ----------------------------- pipeline runner -----------------------------
def _run_attention(hidden_f32, hidden_bf16, mask, bias_terms, params, *,
                   num_heads, head_dim, eps, T, vmem_limit, single_buffer):
    wq, bq, wk, bk, wv, bv, wo, bo, lng, lnb = params
    B, Sp, H = hidden_f32.shape
    NH, DH = num_heads, head_dim
    nT = Sp // T

    # ---- Stage 1: Q/K/V projections, computed once for the whole sequence ----
    qkv_kernel = functools.partial(_qkv_proj_kernel, q_scale=1.0 / math.sqrt(DH))
    flat_shape = jax.ShapeDtypeStruct((B, Sp, H), jnp.bfloat16)
    row_spec = pl.BlockSpec((1, T, H), lambda b, si: (b, si, 0))
    qkv_cost = pl.CostEstimate(
        flops=6 * B * Sp * H * H,
        transcendentals=0,
        bytes_accessed=4 * B * Sp * H * 2 + 6 * H * H * 2)
    q_flat, k_flat, v_flat = pl.pallas_call(
        qkv_kernel,
        grid=(B, nT),
        in_specs=[row_spec] + [_const_spec(p, 2, single_buffer)
                               for p in (wq, bq, wk, bk, wv, bv)],
        out_specs=[row_spec, row_spec, row_spec],
        out_shape=[flat_shape, flat_shape, flat_shape],
        compiler_params=pltpu.CompilerParams(
            dimension_semantics=("parallel", "parallel"),
            vmem_limit_bytes=vmem_limit),
        cost_estimate=qkv_cost,
    )(hidden_bf16, wq, bq, wk, bk, wv, bv)

    # One-time head split to head-major (B, NH, Sp, DH) in plain XLA (tiny vs. the
    # O(B*NH*S^2) bias stream; avoids per-step relayouts inside the attention kernel).
    def to_head_major(x):
        return x.reshape(B, Sp, NH, DH).transpose(0, 2, 1, 3)

    q_hm, k_hm, v_hm = (to_head_major(q_flat), to_head_major(k_flat),
                        to_head_major(v_flat))

    # ---- Stage 2: flash attention over KV tiles + output dense + residual + LN ----
    num_bias = len(bias_terms)
    has_mask = mask is not None
    attn_kernel = functools.partial(
        _flash_attn_kernel, num_bias=num_bias, has_mask=has_mask,
        num_heads=NH, head_dim=DH, bias_scale=1.0 / math.sqrt(DH), eps=eps)

    in_specs = [
        pl.BlockSpec((1, NH, T, DH), lambda b, qi, ki: (b, 0, qi, 0)),   # Q tile
        pl.BlockSpec((1, NH, T, DH), lambda b, qi, ki: (b, 0, ki, 0)),   # K tile
        pl.BlockSpec((1, NH, T, DH), lambda b, qi, ki: (b, 0, ki, 0)),   # V tile
    ]
    operands = [q_hm, k_hm, v_hm]
    for bt in bias_terms:
        in_specs.append(pl.BlockSpec((1, NH, T, T), lambda b, qi, ki: (b, 0, qi, ki)))
        operands.append(bt)
    if has_mask:
        in_specs.append(pl.BlockSpec((1, 1, 1, T), lambda b, qi, ki: (b, 0, 0, ki)))
        operands.append(mask)
    in_specs.append(pl.BlockSpec((1, T, H), lambda b, qi, ki: (b, qi, 0)))  # residual
    operands.append(hidden_f32)
    for p in (wo, bo, lng, lnb):
        in_specs.append(_const_spec(p, 3, single_buffer))
        operands.append(p)

    bias_bytes = sum(int(bt.dtype.itemsize) * B * NH * Sp * Sp for bt in bias_terms)
    attn_cost = pl.CostEstimate(
        flops=4 * B * NH * Sp * Sp * DH + 2 * B * Sp * H * H,
        transcendentals=B * NH * Sp * Sp,
        bytes_accessed=bias_bytes + (1 + 2 * nT) * B * NH * Sp * DH * 2
        + 2 * B * Sp * H * 4 + H * H * 2)

    out = pl.pallas_call(
        attn_kernel,
        grid=(B, nT, nT),
        in_specs=in_specs,
        out_specs=pl.BlockSpec((1, T, H), lambda b, qi, ki: (b, qi, 0)),
        out_shape=jax.ShapeDtypeStruct((B, Sp, H), hidden_f32.dtype),
        scratch_shapes=[pltpu.VMEM((NH, T, 1), jnp.float32),    # running max
                        pltpu.VMEM((NH, T, 1), jnp.float32),    # running denom
                        pltpu.VMEM((NH, T, DH), jnp.float32)],  # unnormalized context
        compiler_params=pltpu.CompilerParams(
            dimension_semantics=("parallel", "parallel", "arbitrary"),
            vmem_limit_bytes=vmem_limit),
        cost_estimate=attn_cost,
    )(*operands)
    return out


# ----------------------------- public wrapper -----------------------------
def layoutlmv3_attention(hidden, attention_mask, rel_pos, rel_2d_pos, params, *,
                         num_heads, eps=1e-5, seq_tile=None):
    """LayoutLMv3Attention.forward (self-attention path, eval mode).

    hidden:          (B, S, H) float32
    attention_mask:  (B, 1, 1, S) additive HF extended mask, or None
    rel_pos:         (B, NH, S, S) relative-position bias, or None
    rel_2d_pos:      (B, NH, S, S) spatial bias, or None
    """
    B, S, H = hidden.shape
    NH = num_heads
    assert H % NH == 0
    DH = H // NH

    vmem_cap = _tpu_vmem_capacity_bytes()
    vmem_limit = int(min(vmem_cap - 16 * 1024 * 1024, 100 * 1024 * 1024))
    if seq_tile is None:
        # 128 on small-VMEM chips (v7x), 256 where >=100 MiB VMEM (v5e/v6e).
        seq_tile = 256 if vmem_cap >= 100 * 1024 * 1024 else 128
    if S <= seq_tile:
        T, Sp = S, S                      # single full-extent tile, no padding needed
    else:
        T = seq_tile
        Sp = _round_up(S, T)              # pad; padded keys are masked below
    pad_s = Sp - S

    hidden_f32 = hidden.astype(jnp.float32)
    if pad_s:
        hidden_f32 = jnp.pad(hidden_f32, ((0, 0), (0, pad_s), (0, 0)))
    hidden_bf16 = hidden_f32.astype(jnp.bfloat16)

    bias_terms = []
    for bt in (rel_pos, rel_2d_pos):
        if bt is None:
            continue
        if pad_s:
            bt = jnp.pad(bt, ((0, 0), (0, 0), (0, pad_s), (0, pad_s)))
        bias_terms.append(bt)

    mask = None
    if attention_mask is not None:
        mask = attention_mask.reshape(B, 1, 1, S).astype(jnp.float32)
    if pad_s:
        if mask is None:
            mask = jnp.zeros((B, 1, 1, S), jnp.float32)
        mask = jnp.pad(mask, ((0, 0), (0, 0), (0, 0), (0, pad_s)),
                       constant_values=-1e9)

    run = functools.partial(_run_attention, hidden_f32, hidden_bf16, mask, bias_terms,
                            params, num_heads=NH, head_dim=DH, eps=eps, T=T,
                            vmem_limit=vmem_limit)
    try:
        out = run(single_buffer=True)
    except Exception:
        # Fallback if pl.Buffered(1) single-buffering is unsupported on this build.
        out = run(single_buffer=False)

    return out[:, :S, :] if pad_s else out


# ----------------------------- parameter init -----------------------------
def init_params(key, H):
    """(Wq, bq, Wk, bk, Wv, bv, Wo, bo, ln_gamma, ln_beta); weights are (in, out)."""
    keys = jax.random.split(key, 4)

    def lin(k, din, dout):
        return (0.02 * jax.random.normal(k, (din, dout), jnp.float32)).astype(jnp.bfloat16)

    wq = lin(keys[0], H, H); bq = jnp.zeros((1, H), jnp.float32)
    wk = lin(keys[1], H, H); bk = jnp.zeros((1, H), jnp.float32)
    wv = lin(keys[2], H, H); bv = jnp.zeros((1, H), jnp.float32)
    wo = lin(keys[3], H, H); bo = jnp.zeros((1, H), jnp.float32)
    lng = jnp.ones((1, H), jnp.float32); lnb = jnp.zeros((1, H), jnp.float32)
    return (wq, bq, wk, bk, wv, bv, wo, bo, lng, lnb)


# ----------------------------- pure-JAX reference (f32) -----------------------------
def _reference(hidden, attention_mask, rel_pos, rel_2d_pos, params, num_heads, eps=1e-5):
    wq, bq, wk, bk, wv, bv, wo, bo, lng, lnb = [p.astype(jnp.float32) for p in params]
    B, S, H = hidden.shape
    DH = H // num_heads

    def split(x):
        return x.reshape(B, S, num_heads, DH).transpose(0, 2, 1, 3)

    q = split(hidden @ wq + bq) / math.sqrt(DH)
    k = split(hidden @ wk + bk)
    v = split(hidden @ wv + bv)
    scores = jnp.einsum('bhqd,bhkd->bhqk', q, k)
    if rel_pos is not None:
        scores = scores + rel_pos / math.sqrt(DH)
    if rel_2d_pos is not None:
        scores = scores + rel_2d_pos / math.sqrt(DH)
    if attention_mask is not None:
        scores = scores + attention_mask
    probs = jax.nn.softmax(scores, axis=-1)
    ctx = jnp.einsum('bhqk,bhkd->bhqd', probs, v).transpose(0, 2, 1, 3).reshape(B, S, H)
    y = ctx @ wo + bo + hidden
    mu = y.mean(-1, keepdims=True)
    var = ((y - mu) ** 2).mean(-1, keepdims=True)
    return (y - mu) * jax.lax.rsqrt(var + eps) * lng + lnb


# ----------------------------- main -----------------------------
if __name__ == "__main__":
    B, S, H, NH = 2, 8, 32, 4

    key = jax.random.PRNGKey(0)
    k_h, k_r1, k_r2, k_p = jax.random.split(key, 4)

    hidden = jax.random.normal(k_h, (B, S, H), jnp.float32)
    # rel_pos / rel_2d_pos are precomputed by the encoder and passed to this module.
    rel_pos = 0.1 * jax.random.normal(k_r1, (B, NH, S, S), jnp.float32)
    rel_2d_pos = 0.1 * jax.random.normal(k_r2, (B, NH, S, S), jnp.float32)
    # HF-style extended attention mask: (B,1,1,S), 0 = keep, -10000 = masked.
    keep = jnp.ones((B, S), jnp.float32).at[1, -2:].set(0.0)
    attention_mask = (1.0 - keep)[:, None, None, :] * -10000.0

    params = init_params(k_p, H)

    out = layoutlmv3_attention(hidden, attention_mask, rel_pos, rel_2d_pos, params,
                               num_heads=NH)
    out = jax.block_until_ready(out)
    assert out.shape == (B, S, H)
    assert bool(jnp.all(jnp.isfinite(out.astype(jnp.float32))))

    ref = _reference(hidden, attention_mask, rel_pos, rel_2d_pos, params, NH)
    max_err = float(jnp.max(jnp.abs(out.astype(jnp.float32) - ref)))
    assert max_err < 5e-2, f"max abs error {max_err}"
    print("KERNEL_OK")
</pallas_src>

<mosaic_0001>
module attributes {stable_mosaic.version = 11 : i64} {
  func.func @_qkv_proj_kernel(%arg0: i32, %arg1: i32, %arg2: memref<1x8x32xbf16, #tpu.memory_space<vmem>>, %arg3: memref<32x32xbf16, #tpu.memory_space<vmem>>, %arg4: memref<1x32xf32, #tpu.memory_space<vmem>>, %arg5: memref<32x32xbf16, #tpu.memory_space<vmem>>, %arg6: memref<1x32xf32, #tpu.memory_space<vmem>>, %arg7: memref<32x32xbf16, #tpu.memory_space<vmem>>, %arg8: memref<1x32xf32, #tpu.memory_space<vmem>>, %arg9: memref<1x8x32xbf16, #tpu.memory_space<vmem>>, %arg10: memref<1x8x32xbf16, #tpu.memory_space<vmem>>, %arg11: memref<1x8x32xbf16, #tpu.memory_space<vmem>>) attributes {dimension_semantics = [#tpu.dimension_semantics<parallel>, #tpu.dimension_semantics<parallel>], iteration_bounds = array<i64: 2, 1>, scalar_prefetch = 0 : i64, scratch_operands = 0 : i64, tpu.core_type = #tpu.core_type<tc>, window_params = [{transform_indices = @transform_0, window_bounds = array<i64: 1, 8, 32>}, {pipeline_mode = #tpu.pipeline_mode<synchronous>, transform_indices = @transform_1, window_bounds = array<i64: 32, 32>}, {pipeline_mode = #tpu.pipeline_mode<synchronous>, transform_indices = @transform_2, window_bounds = array<i64: 1, 32>}, {pipeline_mode = #tpu.pipeline_mode<synchronous>, transform_indices = @transform_3, window_bounds = array<i64: 32, 32>}, {pipeline_mode = #tpu.pipeline_mode<synchronous>, transform_indices = @transform_4, window_bounds = array<i64: 1, 32>}, {pipeline_mode = #tpu.pipeline_mode<synchronous>, transform_indices = @transform_5, window_bounds = array<i64: 32, 32>}, {pipeline_mode = #tpu.pipeline_mode<synchronous>, transform_indices = @transform_6, window_bounds = array<i64: 1, 32>}, {transform_indices = @transform_7, window_bounds = array<i64: 1, 8, 32>}, {transform_indices = @transform_8, window_bounds = array<i64: 1, 8, 32>}, {transform_indices = @transform_9, window_bounds = array<i64: 1, 8, 32>}]} {
    %c0 = arith.constant 0 : index
    %c0_0 = arith.constant 0 : index
    %c0_1 = arith.constant 0 : index
    %0 = vector.load %arg2[%c0, %c0_0, %c0_1] : memref<1x8x32xbf16, #tpu.memory_space<vmem>>, vector<1x8x32xbf16>
    %1 = vector.shape_cast %0 : vector<1x8x32xbf16> to vector<8x32xbf16>
    %c0_2 = arith.constant 0 : index
    %c0_3 = arith.constant 0 : index
    %2 = vector.load %arg3[%c0_2, %c0_3] : memref<32x32xbf16, #tpu.memory_space<vmem>>, vector<32x32xbf16>
    %cst = arith.constant dense<0.000000e+00> : vector<8x32xf32>
    %3 = tpu.matmul %1, %2, %cst {dimension_numbers = #tpu.dot_dimension_numbers<[1], [0], [0], [1], [0, 0, 1, 1], [], []>} : vector<8x32xbf16>, vector<32x32xbf16>, vector<8x32xf32> -> vector<8x32xf32>
    %c0_4 = arith.constant 0 : index
    %c0_5 = arith.constant 0 : index
    %4 = vector.load %arg4[%c0_4, %c0_5] : memref<1x32xf32, #tpu.memory_space<vmem>>, vector<1x32xf32>
    %5 = vector.broadcast %4 : vector<1x32xf32> to vector<8x32xf32>
    %6 = arith.addf %3, %5 : vector<8x32xf32>
    %c0_6 = arith.constant 0 : index
    %c0_7 = arith.constant 0 : index
    %7 = vector.load %arg5[%c0_6, %c0_7] : memref<32x32xbf16, #tpu.memory_space<vmem>>, vector<32x32xbf16>
    %cst_8 = arith.constant dense<0.000000e+00> : vector<8x32xf32>
    %8 = tpu.matmul %1, %7, %cst_8 {dimension_numbers = #tpu.dot_dimension_numbers<[1], [0], [0], [1], [0, 0, 1, 1], [], []>} : vector<8x32xbf16>, vector<32x32xbf16>, vector<8x32xf32> -> vector<8x32xf32>
    %c0_9 = arith.constant 0 : index
    %c0_10 = arith.constant 0 : index
    %9 = vector.load %arg6[%c0_9, %c0_10] : memref<1x32xf32, #tpu.memory_space<vmem>>, vector<1x32xf32>
    %10 = vector.broadcast %9 : vector<1x32xf32> to vector<8x32xf32>
    %11 = arith.addf %8, %10 : vector<8x32xf32>
    %c0_11 = arith.constant 0 : index
    %c0_12 = arith.constant 0 : index
    %12 = vector.load %arg7[%c0_11, %c0_12] : memref<32x32xbf16, #tpu.memory_space<vmem>>, vector<32x32xbf16>
    %cst_13 = arith.constant dense<0.000000e+00> : vector<8x32xf32>
    %13 = tpu.matmul %1, %12, %cst_13 {dimension_numbers = #tpu.dot_dimension_numbers<[1], [0], [0], [1], [0, 0, 1, 1], [], []>} : vector<8x32xbf16>, vector<32x32xbf16>, vector<8x32xf32> -> vector<8x32xf32>
    %c0_14 = arith.constant 0 : index
    %c0_15 = arith.constant 0 : index
    %14 = vector.load %arg8[%c0_14, %c0_15] : memref<1x32xf32, #tpu.memory_space<vmem>>, vector<1x32xf32>
    %15 = vector.broadcast %14 : vector<1x32xf32> to vector<8x32xf32>
    %16 = arith.addf %13, %15 : vector<8x32xf32>
    %cst_16 = arith.constant 0.353553385 : f32
    %17 = vector.broadcast %cst_16 : f32 to vector<8x32xf32>
    %18 = arith.mulf %6, %17 : vector<8x32xf32>
    %19 = arith.truncf %18 : vector<8x32xf32> to vector<8x32xbf16>
    %c0_17 = arith.constant 0 : index
    %c0_18 = arith.constant 0 : index
    %c0_19 = arith.constant 0 : index
    %20 = vector.load %arg9[%c0_17, %c0_18, %c0_19] : memref<1x8x32xbf16, #tpu.memory_space<vmem>>, vector<1x8x32xbf16>
    %21 = vector.shape_cast %20 : vector<1x8x32xbf16> to vector<8x32xbf16>
    %22 = vector.shape_cast %19 : vector<8x32xbf16> to vector<1x8x32xbf16>
    tpu.vector_store %arg9[%c0_17, %c0_18, %c0_19], %22 {strides = array<i32>} : memref<1x8x32xbf16, #tpu.memory_space<vmem>>, vector<1x8x32xbf16>,
    %23 = arith.truncf %11 : vector<8x32xf32> to vector<8x32xbf16>
    %c0_20 = arith.constant 0 : index
    %c0_21 = arith.constant 0 : index
    %c0_22 = arith.constant 0 : index
    %24 = vector.load %arg10[%c0_20, %c0_21, %c0_22] : memref<1x8x32xbf16, #tpu.memory_space<vmem>>, vector<1x8x32xbf16>
    %25 = vector.shape_cast %24 : vector<1x8x32xbf16> to vector<8x32xbf16>
    %26 = vector.shape_cast %23 : vector<8x32xbf16> to vector<1x8x32xbf16>
    tpu.vector_store %arg10[%c0_20, %c0_21, %c0_22], %26 {strides = array<i32>} : memref<1x8x32xbf16, #tpu.memory_space<vmem>>, vector<1x8x32xbf16>,
    %27 = arith.truncf %16 : vector<8x32xf32> to vector<8x32xbf16>
    %c0_23 = arith.constant 0 : index
    %c0_24 = arith.constant 0 : index
    %c0_25 = arith.constant 0 : index
    %28 = vector.load %arg11[%c0_23, %c0_24, %c0_25] : memref<1x8x32xbf16, #tpu.memory_space<vmem>>, vector<1x8x32xbf16>
    %29 = vector.shape_cast %28 : vector<1x8x32xbf16> to vector<8x32xbf16>
    %30 = vector.shape_cast %27 : vector<8x32xbf16> to vector<1x8x32xbf16>
    tpu.vector_store %arg11[%c0_23, %c0_24, %c0_25], %30 {strides = array<i32>} : memref<1x8x32xbf16, #tpu.memory_space<vmem>>, vector<1x8x32xbf16>,
    return
  }
  func.func @transform_0(%arg0: i32, %arg1: i32) -> (i32, i32, i32) {
    %c0_i32 = arith.constant 0 : i32
    %c0_i32_0 = arith.constant 0 : i32
    return %arg0, %arg1, %c0_i32 : i32, i32, i32
  }
  func.func @transform_1(%arg0: i32, %arg1: i32) -> (i32, i32) {
    %c0_i32 = arith.constant 0 : i32
    %c0_i32_0 = arith.constant 0 : i32
    %c0_i32_1 = arith.constant 0 : i32
    return %c0_i32, %c0_i32_0 : i32, i32
  }
  func.func @transform_2(%arg0: i32, %arg1: i32) -> (i32, i32) {
    %c0_i32 = arith.constant 0 : i32
    %c0_i32_0 = arith.constant 0 : i32
    %c0_i32_1 = arith.constant 0 : i32
    return %c0_i32, %c0_i32_0 : i32, i32
  }
  func.func @transform_3(%arg0: i32, %arg1: i32) -> (i32, i32) {
    %c0_i32 = arith.constant 0 : i32
    %c0_i32_0 = arith.constant 0 : i32
    %c0_i32_1 = arith.constant 0 : i32
    return %c0_i32, %c0_i32_0 : i32, i32
  }
  func.func @transform_4(%arg0: i32, %arg1: i32) -> (i32, i32) {
    %c0_i32 = arith.constant 0 : i32
    %c0_i32_0 = arith.constant 0 : i32
    %c0_i32_1 = arith.constant 0 : i32
    return %c0_i32, %c0_i32_0 : i32, i32
  }
  func.func @transform_5(%arg0: i32, %arg1: i32) -> (i32, i32) {
    %c0_i32 = arith.constant 0 : i32
    %c0_i32_0 = arith.constant 0 : i32
    %c0_i32_1 = arith.constant 0 : i32
    return %c0_i32, %c0_i32_0 : i32, i32
  }
  func.func @transform_6(%arg0: i32, %arg1: i32) -> (i32, i32) {
    %c0_i32 = arith.constant 0 : i32
    %c0_i32_0 = arith.constant 0 : i32
    %c0_i32_1 = arith.constant 0 : i32
    return %c0_i32, %c0_i32_0 : i32, i32
  }
  func.func @transform_7(%arg0: i32, %arg1: i32) -> (i32, i32, i32) {
    %c0_i32 = arith.constant 0 : i32
    %c0_i32_0 = arith.constant 0 : i32
    return %arg0, %arg1, %c0_i32 : i32, i32, i32
  }
  func.func @transform_8(%arg0: i32, %arg1: i32) -> (i32, i32, i32) {
    %c0_i32 = arith.constant 0 : i32
    %c0_i32_0 = arith.constant 0 : i32
    return %arg0, %arg1, %c0_i32 : i32, i32, i32
  }
  func.func @transform_9(%arg0: i32, %arg1: i32) -> (i32, i32, i32) {
    %c0_i32 = arith.constant 0 : i32
    %c0_i32_0 = arith.constant 0 : i32
    return %arg0, %arg1, %c0_i32 : i32, i32, i32
  }
}

module attributes {stable_mosaic.version = 11 : i64} {
  func.func @_qkv_proj_kernel(%arg0: i32, %arg1: i32, %arg2: memref<1x8x32xbf16, #tpu.memory_space<vmem>>, %arg3: memref<32x32xbf16, #tpu.memory_space<vmem>>, %arg4: memref<1x32xf32, #tpu.memory_space<vmem>>, %arg5: memref<32x32xbf16, #tpu.memory_space<vmem>>, %arg6: memref<1x32xf32, #tpu.memory_space<vmem>>, %arg7: memref<32x32xbf16, #tpu.memory_space<vmem>>, %arg8: memref<1x32xf32, #tpu.memory_space<vmem>>, %arg9: memref<1x8x32xbf16, #tpu.memory_space<vmem>>, %arg10: memref<1x8x32xbf16, #tpu.memory_space<vmem>>, %arg11: memref<1x8x32xbf16, #tpu.memory_space<vmem>>) attributes {dimension_semantics = [#tpu.dimension_semantics<parallel>, #tpu.dimension_semantics<parallel>], iteration_bounds = array<i64: 2, 1>, scalar_prefetch = 0 : i64, scratch_operands = 0 : i64, tpu.core_type = #tpu.core_type<tc>, window_params = [{transform_indices = @transform_0, window_bounds = array<i64: 1, 8, 32>}, {pipeline_mode = #tpu.pipeline_mode<synchronous>, transform_indices = @transform_1, window_bounds = array<i64: 32, 32>}, {pipeline_mode = #tpu.pipeline_mode<synchronous>, transform_indices = @transform_2, window_bounds = array<i64: 1, 32>}, {pipeline_mode = #tpu.pipeline_mode<synchronous>, transform_indices = @transform_3, window_bounds = array<i64: 32, 32>}, {pipeline_mode = #tpu.pipeline_mode<synchronous>, transform_indices = @transform_4, window_bounds = array<i64: 1, 32>}, {pipeline_mode = #tpu.pipeline_mode<synchronous>, transform_indices = @transform_5, window_bounds = array<i64: 32, 32>}, {pipeline_mode = #tpu.pipeline_mode<synchronous>, transform_indices = @transform_6, window_bounds = array<i64: 1, 32>}, {transform_indices = @transform_7, window_bounds = array<i64: 1, 8, 32>}, {transform_indices = @transform_8, window_bounds = array<i64: 1, 8, 32>}, {transform_indices = @transform_9, window_bounds = array<i64: 1, 8, 32>}]} {
    %c0 = arith.constant 0 : index
    %c0_0 = arith.constant 0 : index
    %c0_1 = arith.constant 0 : index
    %0 = vector.load %arg2[%c0, %c0_0, %c0_1] : memref<1x8x32xbf16, #tpu.memory_space<vmem>>, vector<1x8x32xbf16>
    %1 = vector.shape_cast %0 : vector<1x8x32xbf16> to vector<8x32xbf16>
    %c0_2 = arith.constant 0 : index
    %c0_3 = arith.constant 0 : index
    %2 = vector.load %arg3[%c0_2, %c0_3] : memref<32x32xbf16, #tpu.memory_space<vmem>>, vector<32x32xbf16>
    %cst = arith.constant dense<0.000000e+00> : vector<8x32xf32>
    %3 = tpu.matmul %1, %2, %cst {dimension_numbers = #tpu.dot_dimension_numbers<[1], [0], [0], [1], [0, 0, 1, 1], [], []>} : vector<8x32xbf16>, vector<32x32xbf16>, vector<8x32xf32> -> vector<8x32xf32>
    %c0_4 = arith.constant 0 : index
    %c0_5 = arith.constant 0 : index
    %4 = vector.load %arg4[%c0_4, %c0_5] : memref<1x32xf32, #tpu.memory_space<vmem>>, vector<1x32xf32>
    %5 = vector.broadcast %4 : vector<1x32xf32> to vector<8x32xf32>
    %6 = arith.addf %3, %5 : vector<8x32xf32>
    %c0_6 = arith.constant 0 : index
    %c0_7 = arith.constant 0 : index
    %7 = vector.load %arg5[%c0_6, %c0_7] : memref<32x32xbf16, #tpu.memory_space<vmem>>, vector<32x32xbf16>
    %cst_8 = arith.constant dense<0.000000e+00> : vector<8x32xf32>
    %8 = tpu.matmul %1, %7, %cst_8 {dimension_numbers = #tpu.dot_dimension_numbers<[1], [0], [0], [1], [0, 0, 1, 1], [], []>} : vector<8x32xbf16>, vector<32x32xbf16>, vector<8x32xf32> -> vector<8x32xf32>
    %c0_9 = arith.constant 0 : index
    %c0_10 = arith.constant 0 : index
    %9 = vector.load %arg6[%c0_9, %c0_10] : memref<1x32xf32, #tpu.memory_space<vmem>>, vector<1x32xf32>
    %10 = vector.broadcast %9 : vector<1x32xf32> to vector<8x32xf32>
    %11 = arith.addf %8, %10 : vector<8x32xf32>
    %c0_11 = arith.constant 0 : index
    %c0_12 = arith.constant 0 : index
    %12 = vector.load %arg7[%c0_11, %c0_12] : memref<32x32xbf16, #tpu.memory_space<vmem>>, vector<32x32xbf16>
    %cst_13 = arith.constant dense<0.000000e+00> : vector<8x32xf32>
    %13 = tpu.matmul %1, %12, %cst_13 {dimension_numbers = #tpu.dot_dimension_numbers<[1], [0], [0], [1], [0, 0, 1, 1], [], []>} : vector<8x32xbf16>, vector<32x32xbf16>, vector<8x32xf32> -> vector<8x32xf32>
    %c0_14 = arith.constant 0 : index
    %c0_15 = arith.constant 0 : index
    %14 = vector.load %arg8[%c0_14, %c0_15] : memref<1x32xf32, #tpu.memory_space<vmem>>, vector<1x32xf32>
    %15 = vector.broadcast %14 : vector<1x32xf32> to vector<8x32xf32>
    %16 = arith.addf %13, %15 : vector<8x32xf32>
    %cst_16 = arith.constant 0.353553385 : f32
    %17 = vector.broadcast %cst_16 : f32 to vector<8x32xf32>
    %18 = arith.mulf %6, %17 : vector<8x32xf32>
    %19 = arith.truncf %18 : vector<8x32xf32> to vector<8x32xbf16>
    %c0_17 = arith.constant 0 : index
    %c0_18 = arith.constant 0 : index
    %c0_19 = arith.constant 0 : index
    %20 = vector.load %arg9[%c0_17, %c0_18, %c0_19] : memref<1x8x32xbf16, #tpu.memory_space<vmem>>, vector<1x8x32xbf16>
    %21 = vector.shape_cast %20 : vector<1x8x32xbf16> to vector<8x32xbf16>
    %22 = vector.shape_cast %19 : vector<8x32xbf16> to vector<1x8x32xbf16>
    tpu.vector_store %arg9[%c0_17, %c0_18, %c0_19], %22 {strides = array<i32>} : memref<1x8x32xbf16, #tpu.memory_space<vmem>>, vector<1x8x32xbf16>,
    %23 = arith.truncf %11 : vector<8x32xf32> to vector<8x32xbf16>
    %c0_20 = arith.constant 0 : index
    %c0_21 = arith.constant 0 : index
    %c0_22 = arith.constant 0 : index
    %24 = vector.load %arg10[%c0_20, %c0_21, %c0_22] : memref<1x8x32xbf16, #tpu.memory_space<vmem>>, vector<1x8x32xbf16>
    %25 = vector.shape_cast %24 : vector<1x8x32xbf16> to vector<8x32xbf16>
    %26 = vector.shape_cast %23 : vector<8x32xbf16> to vector<1x8x32xbf16>
    tpu.vector_store %arg10[%c0_20, %c0_21, %c0_22], %26 {strides = array<i32>} : memref<1x8x32xbf16, #tpu.memory_space<vmem>>, vector<1x8x32xbf16>,
    %27 = arith.truncf %16 : vector<8x32xf32> to vector<8x32xbf16>
    %c0_23 = arith.constant 0 : index
    %c0_24 = arith.constant 0 : index
    %c0_25 = arith.constant 0 : index
    %28 = vector.load %arg11[%c0_23, %c0_24, %c0_25] : memref<1x8x32xbf16, #tpu.memory_space<vmem>>, vector<1x8x32xbf16>
    %29 = vector.shape_cast %28 : vector<1x8x32xbf16> to vector<8x32xbf16>
    %30 = vector.shape_cast %27 : vector<8x32xbf16> to vector<1x8x32xbf16>
    tpu.vector_store %arg11[%c0_23, %c0_24, %c0_25], %30 {strides = array<i32>} : memref<1x8x32xbf16, #tpu.memory_space<vmem>>, vector<1x8x32xbf16>,
    return
  }
  func.func @transform_0(%arg0: i32, %arg1: i32) -> (i32, i32, i32) {
    %c0_i32 = arith.constant 0 : i32
    %c0_i32_0 = arith.constant 0 : i32
    return %arg0, %arg1, %c0_i32 : i32, i32, i32
  }
  func.func @transform_1(%arg0: i32, %arg1: i32) -> (i32, i32) {
    %c0_i32 = arith.constant 0 : i32
    %c0_i32_0 = arith.constant 0 : i32
    %c0_i32_1 = arith.constant 0 : i32
    return %c0_i32, %c0_i32_0 : i32, i32
  }
  func.func @transform_2(%arg0: i32, %arg1: i32) -> (i32, i32) {
    %c0_i32 = arith.constant 0 : i32
    %c0_i32_0 = arith.constant 0 : i32
    %c0_i32_1 = arith.constant 0 : i32
    return %c0_i32, %c0_i32_0 : i32, i32
  }
  func.func @transform_3(%arg0: i32, %arg1: i32) -> (i32, i32) {
    %c0_i32 = arith.constant 0 : i32
    %c0_i32_0 = arith.constant 0 : i32
    %c0_i32_1 = arith.constant 0 : i32
    return %c0_i32, %c0_i32_0 : i32, i32
  }
  func.func @transform_4(%arg0: i32, %arg1: i32) -> (i32, i32) {
    %c0_i32 = arith.constant 0 : i32
    %c0_i32_0 = arith.constant 0 : i32
    %c0_i32_1 = arith.constant 0 : i32
    return %c0_i32, %c0_i32_0 : i32, i32
  }
  func.func @transform_5(%arg0: i32, %arg1: i32) -> (i32, i32) {
    %c0_i32 = arith.constant 0 : i32
    %c0_i32_0 = arith.constant 0 : i32
    %c0_i32_1 = arith.constant 0 : i32
    return %c0_i32, %c0_i32_0 : i32, i32
  }
  func.func @transform_6(%arg0: i32, %arg1: i32) -> (i32, i32) {
    %c0_i32 = arith.constant 0 : i32
    %c0_i32_0 = arith.constant 0 : i32
    %c0_i32_1 = arith.constant 0 : i32
    return %c0_i32, %c0_i32_0 : i32, i32
  }
  func.func @transform_7(%arg0: i32, %arg1: i32) -> (i32, i32, i32) {
    %c0_i32 = arith.constant 0 : i32
    %c0_i32_0 = arith.constant 0 : i32
    return %arg0, %arg1, %c0_i32 : i32, i32, i32
  }
  func.func @transform_8(%arg0: i32, %arg1: i32) -> (i32, i32, i32) {
    %c0_i32 = arith.constant 0 : i32
    %c0_i32_0 = arith.constant 0 : i32
    return %arg0, %arg1, %c0_i32 : i32, i32, i32
  }
  func.func @transform_9(%arg0: i32, %arg1: i32) -> (i32, i32, i32) {
    %c0_i32 = arith.constant 0 : i32
    %c0_i32_0 = arith.constant 0 : i32
    return %arg0, %arg1, %c0_i32 : i32, i32, i32
  }
}

</mosaic_0001>

<bundles_post_ra>
// kernel: tpu_custom_call.1
= control target key start
LH: loop header
LB: loop body
LE: loop exit
PB: predicated region body
PF: predicated region fallthrough
CT: control target
= control target key end

     0   :  { %s1521_s0 = inlined_call_operand.hbm [shape: bf16[2,8,32], index: 0, kind: input, shape index: {}]   ;;  %s1522_s1 = inlined_call_operand.hbm [shape: bf16[32,32], index: 1, kind: input, shape index: {}]   ;;  %s1523_s2 = inlined_call_operand.vmem [shape: f32[1,32], index: 2, kind: input, shape index: {}]   ;;  %s1524_s3 = inlined_call_operand.hbm [shape: bf16[32,32], index: 3, kind: input, shape index: {}]   ;;  %s1525_s4 = inlined_call_operand.vmem [shape: f32[1,32], index: 4, kind: input, shape index: {}]   ;;  %s1526_s5 = inlined_call_operand.hbm [shape: bf16[32,32], index: 5, kind: input, shape index: {}]   ;;  %s1527_s6 = inlined_call_operand.vmem [shape: f32[1,32], index: 6, kind: input, shape index: {}]   ;;  %s1528_s7 = inlined_call_operand.hbm [shape: bf16[2,8,32], index: 7, kind: output, shape index: {0}]   ;;  %s1529_s8 = inlined_call_operand.hbm [shape: bf16[2,8,32], index: 8, kind: output, shape index: {1}]   ;;  %s1530_s9 = inlined_call_operand.hbm [shape: bf16[2,8,32], index: 9, kind: output, shape index: {2}]  }
   0x1   :  { %1533 = sst [smem:[#allocation20_spill]] %s1521_s0 }
   0x2   :  { %1534 = sst [smem:[#allocation21_spill]] %s1522_s1 }
   0x3   :  { %1535 = sst [smem:[#allocation22_spill]] %s1523_s2 }
   0x4   :  { %1536 = sst [smem:[#allocation23_spill]] %s1524_s3 }
   0x5   :  { %1537 = sst [smem:[#allocation24_spill]] %s1525_s4 }
   0x6   :  { %1538 = sst [smem:[#allocation25_spill]] %s1526_s5 }
   0x7   :  { %15 = vsyncpa [#allocation3], 0 }
   0x8   :  { %17 = vsyncpa [#allocation3 + $0x1], 0 }
   0x9   :  { %18 = vsyncpa [#allocation6], 0 }
   0xa   :  { %19 = vsyncpa [#allocation9], 0 }
   0xb   :  { %20 = vsyncpa [#allocation4], 0 }
   0xc   :  { %22 = vsyncpa [#allocation4 + $0x1], 0 }
   0xd   :  { %23 = vsyncpa [#allocation12], 0 }
   0xe   :  { %25 = vsyncpa [#allocation12 + $0x1], 0  ;;  %s1276_s30 = smov 0   ;;  %s1278_s10 = smov 0  }
   0xf   :  { %s1280_s11 = smov 0   ;;  %s1282_s12 = smov 0  }
  0x10   :  { %s1284_s13 = smov 0   ;;  %s1286_s14 = smov 0  }
  0x11 LB: > { %s1307_s15 = sadd.s32 4294967295, %s1219_s14   ;;  %p785_p0 = scmp.ge.s32.totalorder %s1219_s14, 1  ;;  %s1219_s14 = sphi %s1286_s14, %s31_s14   ;;  %s1215_s13 = sphi %s1284_s13, %s1558_s13   ;;  %s1211_s12 = sphi %s1282_s12, %s1557_s12   ;;  %s1207_s11 = sphi %s1280_s11, %s1556_s11   ;;  %s1203_s10 = sphi %s1278_s10, %s1555_s10   ;;  %s1199_s30 = sphi %s1276_s30, %s1554_s30  }
  0x12   : > { %p66_p1 = scmp.eq.s32.totalorder %s1307_s15, 0  ;;  %p286_p2 = scmp.lt.s32.totalorder %s1219_s14, 3 }
  0x13   : > { %s1539_s1 = sld [smem:[#allocation21_spill]]  ;;  %s1221_s20 = smov [#allocation5]  }
  0x14   : > { %p1315_p3 = pnand %p785_p0, %p286_p2  ;;  %s299_s21 = sshll.u32 %s1221_s20, 4  ;;  %s300_s21 = int_to_ptr.vmem [resolvable:$true] %s299_s21 }
  0x15   : > { %p789_p6 = scmp.ge.s32.totalorder %s1219_s14, 2  ;;  %s1542_s3 = sld [smem:[#allocation23_spill]] }
  0x16   : > { %p861_p4 = pneg %p1315_p3  ;;  %s1222_s26 = smov 64  }
  0x17   : > { %s1223_s27 = smov 4   ;;  %s1224_s28 = smov [#allocation7]  }
  0x18   : > { %p1323_p5 = pnand %p861_p4, %p66_p1  ;;  %s316_s29 = sshll.u32 %s1224_s28, 4  ;;  %s317_s29 = int_to_ptr.vmem [resolvable:$true] %s316_s29 }
  0x19   : > { %s297_s18 = sshll.u32 %s1539_s1, 4  ;;  %s1543_s5 = sld [smem:[#allocation25_spill]]  ;;  %s298_s18 = int_to_ptr.hbm [resolvable:$true] %s297_s18 }
  0x1a   : > { %864 = dma.hbm_to_vmem [thread:$0]  (!%p1323_p5), %s298_s18, 256, %s300_s21, [#allocation6], %s1222_s26, %s1222_s26, %s1223_s27  }
  0x1b   : > { %s314_s25 = sshll.u32 %s1542_s3, 4  ;;  %s1225_s23 = smov [#allocation8]   ;;  %s315_s25 = int_to_ptr.hbm [resolvable:$true] %s314_s25 }
  0x1c   : > { %867 = dma.hbm_to_vmem [thread:$0]  (!%p1323_p5), %s315_s25, 256, %s317_s29, [#allocation6], %s1222_s26, %s1222_s26, %s1223_s27  }
  0x1d   : > { %s333_s24 = sshll.u32 %s1225_s23, 4  ;;  %s1531_s18 = sadd.s32 4294967294, %s1219_s14   ;;  %s334_s24 = int_to_ptr.vmem [resolvable:$true] %s333_s24 }
  0x1e   : > { %s43_s21 = sadd.s32 1, %s1215_s13  ;;  %s52_s28 = sadd.s32 1, %s1207_s11 }
  0x1f   : > { %s331_s20 = sshll.u32 %s1543_s5, 4  ;;  %p45_p7 = scmp.ge.s32.totalorder %s43_s21, 2  ;;  %s332_s20 = int_to_ptr.hbm [resolvable:$true] %s331_s20 }
  0x20   : > { %870 = dma.hbm_to_vmem [thread:$0]  (!%p1323_p5), %s332_s20, 256, %s334_s24, [#allocation9], %s1222_s26, %s1222_s26, %s1223_s27  }
  0x21   : > { %p59_p8 = scmp.ne.s32.totalorder %s1207_s11, %s1203_s10  ;;  %p60_p9 = scmp.eq.s32.totalorder %s1219_s14, 0 }
  0x22   : > { %p65_p10 = scmp.ne.s32.totalorder %s1203_s10, %s1199_s30  ;;  %s1560_s21 = smov (%p45_p7, %s43_s21), 0 }
  0x23   : > { %1544 = sst [smem:[#allocation19_spill]] %s1560_s21  ;;  %p1350_p11 = por %p60_p9, %p59_p8 }
  0x24   : > { %p1356_p12 = por %p66_p1, %p65_p10  ;;  %s47_s26 = ssub.s32 %s1215_s13, %s1560_s21 }
  0x25   : > { %p217_p13 = scmp.eq.s32.totalorder %s1307_s15, 1  ;;  %p50_p0 = scmp.eq.s32.totalorder %s47_s26, 0 }
  0x26   : > { %p223_p2 = scmp.eq.s32.totalorder %s1531_s18, 1  ;;  %p888_p5 = scmp.lt.s32.totalorder %s1219_s14, 2 }
  0x27   : > { %p1365_p4 = por %p217_p13, %p59_p8  ;;  %s350_s17 = sand.u32 1, %s1207_s11  }
  0x28   : > { %s1371_s29 = scalar_select %p50_p0, %s1207_s11, %s52_s28  }
  0x29   : > { %p1373_p7 = por %p223_p2, %p65_p10  ;;  %s790_s20 = sshll.u32 %s350_s17, 2 }
  0x2a   : > { %s791_s23 = sshll.u32 %s1215_s13, 2  ;;  %s1549_s0 = sld [smem:[#allocation20_spill]] }
  0x2b   : > { %s354_s3 = scalar_lea.vmem [#allocation2], %s790_s20  ;;  %p872_p8 = pnand %p888_p5, %p1350_p11 }
  0x2c   : > { %s363_s18 = sshll.u32 %s354_s3, 4  ;;  %s351_s28 = scalar_lea.sflag [#allocation3], %s350_s17  ;;  %s364_s18 = int_to_ptr.vmem [resolvable:$true] %s363_s18 }
  0x2d   : > { %s1387_s21 = sand.u32 (!%p1315_p3), 1, %s1203_s10  }
  0x2e   : > { %372 = sbr.rel (%p1315_p3) target bundleno = 223 (0xdf), region = 48  ;;  %s1390_s1 = sshll.u32 (!%p1315_p3), %s1387_s21, 2 }
  0x2f   : > { %s375_s3 = scalar_lea.sflag (!%p1315_p3), [#allocation3], %s1387_s21  ;;  %s378_s20 = scalar_lea.vmem (!%p1315_p3), [#allocation2], %s1390_s1 }
  0x30   : > { %s359_s26 = scalar_lea.hbm %s1549_s0, %s791_s23 }
  0x31   : > { %s361_s5 = sshll.u32 %s359_s26, 4  ;;  %s362_s5 = int_to_ptr.hbm [resolvable:$true] %s361_s5 }
  0x32   : > { %874 = dma.hbm_to_vmem [thread:$0]  (!%p872_p8), %s362_s5, 64, %s364_s18, %s351_s28  }
  0x33   : > { %1178 = dma.done.wait (%p1356_p12), %s375_s3, 64  }
  0x34   : > { %1180 = vsyncadd (%p1356_p12), %s375_s3, 4294967232 }
  0x35   : > { %1182 = dma.done.wait (%p66_p1), [#allocation6], 512  }
  0x36   : > { %1184 = vsyncadd (%p66_p1), [#allocation6], 4294966784 }
  0x37   : > { %1186 = dma.done.wait (%p66_p1), [#allocation9], 256  }
  0x38   : > { %1188 = vsyncadd (%p66_p1), [#allocation9], 4294967040  ;;  %v836_v0 = vld [vmem:[#allocation5 + $0x8] sm:$0xff]  ;;  %v838_v1 = vld [vmem:[#allocation7 + $0x8] sm:$0xff]  ;;  %vm461_vm0 = vcmask 261120   ;;  %s1407_s5 = sshll.u32 %s1211_s12, 2 }
  0x39   : > { %v840_v2 = vld [vmem:[#allocation8 + $0x8] sm:$0xff]  ;;  %471 = vmatpush.bf16.msra.mxu0 %v836_v0  ;;  %504 = vmatpush.bf16.msra.mxu1 %v838_v1  ;;  %v835_v3 = vld [vmem:[#allocation5] sm:$0xff]  ;;  %v837_v4 = vld [vmem:[#allocation7] sm:$0xff]  ;;  %s1550_s2 = sld [smem:[#allocation22_spill]]  ;;  %s589_s24 = scalar_lea.hbm %s1529_s8, %s1407_s5  ;;  %vm546_vm1 = vcmask 257024  }
  0x3a   : > { %537 = vmatpush.bf16.msra.mxu2 %v840_v2  ;;  %v839_v5 = vld [vmem:[#allocation8] sm:$0xff]  ;;  %v440_v6 = vld [vmem:[%s378_s20] sm:$0xf]  ;;  %s1551_s4 = sld [smem:[#allocation24_spill]]  ;;  %s557_s26 = sand.u32 1, %s1307_s15  }
  0x3b   : > { %s431_s28 = scalar_lea.vmem [#allocation11], %s1390_s1  ;;  %s574_s19 = scalar_lea.hbm %s1528_s7, %s1407_s5  ;;  %v948_v15 = vld [vmem:[%s1527_s6] ss:$0 sm:$0xff] }
  0x3c   : > { %s1421_s3 = sshll.u32 %s431_s28, 4  ;;  %s1427_s18 = sshll.u32 %s589_s24, 4  ;;  %s592_s3 = int_to_ptr.vmem [resolvable:$true] %s1421_s3  ;;  %s594_s18 = int_to_ptr.hbm [resolvable:$true] %s1427_s18 }
  0x3d   : > { %472 = vmatpush.bf16.msra.mxu0 %v835_v3  ;;  %505 = vmatpush.bf16.msra.mxu1 %v837_v4  ;;  %s424_s25 = scalar_lea.vmem [#allocation10], %s1390_s1  ;;  %s1433_s22 = sshll.u32 %s574_s19, 4  ;;  %s579_s22 = int_to_ptr.hbm [resolvable:$true] %s1433_s22 }
  0x3e   : > { %538 = vmatpush.bf16.msra.mxu2 %v839_v5  ;;  %s1431_s15 = sshll.u32 %s424_s25, 4  ;;  %s604_s20 = scalar_lea.hbm %s1530_s9, %s1407_s5  ;;  %s577_s15 = int_to_ptr.vmem [resolvable:$true] %s1431_s15 }
  0x3f   : > { %v946_v7 = vld [vmem:[%s1550_s2] ss:$0 sm:$0xff]  ;;  %s1446_s0 = scalar_lea.sflag [#allocation12], %s557_s26  ;;  %s1083_s19 = sshra.s32 %s594_s18, 4  ;;  %s1084_s19 = int_to_ptr.hbm [resolvable:$true] %s1083_s19 }
  0x40   : > { %808 = vmatmul.msk.bf16.vlgmr.msra.gmra.mxu0 %vm461_vm0, %v440_v6  ;;  %817 = vmatmul.msk.bf16.vlgmr.msra.gmra.mxu1 %vm461_vm0, %v440_v6  ;;  %v947_v8 = vld [vmem:[%s1551_s4] ss:$0 sm:$0xff]  ;;  %s1085_s2 = scalar_lea.hbm %s1084_s19, 4  ;;  %s1089_s4 = scalar_lea.hbm %s1529_s8, 8 }
  0x41   : > { %826 = vmatmul.msk.bf16.vlgmr.msra.gmra.mxu2 %vm461_vm0, %v440_v6  ;;  %p1086_p1 = scmp.ne.s32.totalorder %s1084_s19, %s1085_s2  ;;  %p1090_p10 = scmp.lt.s32.totalorder %s1084_s19, %s1529_s8 }
  0x42   : > { %p1091_p11 = scmp.lt.s32.totalorder %s1089_s4, %s1085_s2 }
  0x43   : > { %p1087_p3 = pnand %p1086_p1, %p1365_p4 }
  0x44   : > { %p1092_p12 = por %p1091_p11, %p1090_p10 }
  0x45   : > { %p1088_p9 = pneg %p1087_p3 }
  0x47   : > { %p1093_p13 = pnand %p1092_p12, %p1088_p9 }
  0xbd   : > { %v474_v9 = vpop.f32.mrf.mxu0  ;;  %v507_v10 = vpop.f32.mrf.mxu1 }
  0xbe   : > { %v475_v11 = vadd.f32 %v946_v7, %v474_v9  ;;  %v508_v12 = vadd.f32 %v947_v8, %v507_v10 }
  0xc0   : > { %v544_v13 = vmul.f32 0.35355338, %v475_v11  ;;  %v548_v14 = vpack.c.bf16 %v508_v12, %v508_v12 }
  0xc2   : > { %v545_v16 = vpack.c.bf16 %v544_v13, %v544_v13  ;;  %549 = vst.msk [vmem:[%s431_s28] sm:$0xf] %vm546_vm1, %v548_v14 }
  0xc3   : > { %1096 = shalt.err (!%p1093_p13)
}
  0xc4   : > { %856 = dma.vmem_to_hbm [thread:$0]  (%p1365_p4), %s592_s3, 64, %s594_s18, %s1446_s0   ;;  %v540_v17 = vpop.f32.mrf.mxu2  ;;  %547 = vst.msk [vmem:[%s424_s25] sm:$0xf] %vm546_vm1, %v545_v16 }
  0xc5   : > { %s438_s26 = scalar_lea.vmem [#allocation13], %s1390_s1  ;;  %s1463_s12 = sshll.u32 %s604_s20, 4  ;;  %v541_v18 = vadd.f32 %v948_v15, %v540_v17  ;;  %v476_v19 = vpop.f32.mrf.mxu0  ;;  %v509_v20 = vpop.f32.mrf.mxu1  ;;  %s609_s12 = int_to_ptr.hbm [resolvable:$true] %s1463_s12 }
  0xc6   : > { %s1461_s28 = sshll.u32 %s438_s26, 4  ;;  %s553_s2 = scalar_lea.sflag [#allocation4], %s1387_s21  ;;  %s607_s28 = int_to_ptr.vmem [resolvable:$true] %s1461_s28 }
  0xc7   : > { %s1111_s4 = sshra.s32 %s579_s22, 4  ;;  %s1117_s1 = scalar_lea.hbm %s1528_s7, 8  ;;  %s1112_s4 = int_to_ptr.hbm [resolvable:$true] %s1111_s4 }
  0xc8   : > { %s1113_s19 = scalar_lea.hbm %s1112_s4, 4  ;;  %p1118_p8 = scmp.lt.s32.totalorder %s1112_s4, %s1528_s7 }
  0xc9   : > { %p1114_p0 = scmp.ne.s32.totalorder %s1112_s4, %s1113_s19  ;;  %p1119_p1 = scmp.lt.s32.totalorder %s1117_s1, %s1113_s19 }
  0xcb   : > { %p1115_p2 = pnand %p1114_p0, %p1365_p4  ;;  %p1120_p3 = por %p1119_p1, %p1118_p8 }
  0xcd   : > { %p1116_p5 = pneg %p1115_p2 }
  0xcf   : > { %p1121_p9 = pnand %p1120_p3, %p1116_p5 }
  0xd1   : > { %1124 = shalt.err (!%p1121_p9)
}
  0xd2   : > { %855 = dma.vmem_to_hbm [thread:$0]  (%p1365_p4), %s577_s15, 64, %s579_s22, %s553_s2   ;;  %v550_v21 = vpack.c.bf16 %v541_v18, %v541_v18 }
  0xd3   : > { %s1139_s21 = sshra.s32 %s609_s12, 4  ;;  %s1145_s5 = scalar_lea.hbm %s1530_s9, 8  ;;  %s1140_s21 = int_to_ptr.hbm [resolvable:$true] %s1139_s21 }
  0xd4   : > { %551 = vst.msk [vmem:[%s438_s26] sm:$0xf] %vm546_vm1, %v550_v21  ;;  %s1141_s20 = scalar_lea.hbm %s1140_s21, 4  ;;  %p1146_p13 = scmp.lt.s32.totalorder %s1140_s21, %s1530_s9 }
  0xd5   : > { %p1142_p10 = scmp.ne.s32.totalorder %s1140_s21, %s1141_s20  ;;  %p1147_p0 = scmp.lt.s32.totalorder %s1145_s5, %s1141_s20 }
  0xd7   : > { %p1143_p11 = pnand %p1142_p10, %p1365_p4  ;;  %p1148_p2 = por %p1147_p0, %p1146_p13 }
  0xd9   : > { %p1144_p12 = pneg %p1143_p11 }
  0xdb   : > { %p1149_p5 = pnand %p1148_p2, %p1144_p12 }
  0xdd   : > { %1152 = shalt.err (!%p1149_p5)
}
  0xde   : > { %857 = dma.vmem_to_hbm [thread:$0]  (%p1365_p4), %s607_s28, 64, %s609_s12, %s1446_s0   ;;  %v542_v22 = vpop.f32.mrf.mxu2 }
  0xdf PF: > { %s620_s15 = sand.u32 1, %s1199_s30   ;;  %p876_p8 = pnand %p789_p6, %p1373_p7 }
  0xe0   : > { %s621_s22 = scalar_lea.sflag [#allocation4], %s620_s15 }
  0xe1   : > { %p877_p1 = pneg %p876_p8 }
  0xe3   : > { %1190 = dma.done.wait (%p877_p1), %s621_s22, 64  }
  0xe4   : > { %1192 = vsyncadd (%p877_p1), %s621_s22, 4294967232  ;;  %s1552_s26 = sadd.s32 4294967294, %s1219_s14  }
  0xe5   : > { %s630_s2 = sand.u32 1, %s1552_s26  }
  0xe6   : > { %s631_s3 = scalar_lea.sflag [#allocation12], %s630_s2 }
  0xe7   : > { %1194 = dma.done.wait (%p877_p1), %s631_s3, 128  }
  0xe8   : > { %1196 = vsyncadd (%p877_p1), %s631_s3, 4294967168  ;;  %s31_s14 = sadd.s32 1, %s1219_s14   ;;  %s1553_s0 = sld [smem:[#allocation19_spill]] }
  0xe9   : > { %p28_p4 = scmp.ge.s32.totalorder %s31_s14, 4   ;;  %s1554_s30 = smov %s1203_s10 }
  0xea   : > { %s1555_s10 = smov %s1207_s11  ;;  %s1556_s11 = smov %s1371_s29 }
  0xeb   : > { %s1557_s12 = smov %s1215_s13  ;;  %30 = sbr.rel (!%p28_p4) target bundleno = 17 (0x11), region = 137 }
  0xee   : > { %s1558_s13 = smov %s1553_s0 }
  0xf0   :  { %647 = vsyncpa [#allocation3], 1 }
  0xf1   :  { %649 = vsyncpa [#allocation3 + $0x1], 1 }
  0xf2   :  { %650 = vsyncpa [#allocation6], 1 }
  0xf3   :  { %651 = vsyncpa [#allocation9], 1 }
  0xf4   :  { %652 = vsyncpa [#allocation4], 1 }
  0xf5   :  { %654 = vsyncpa [#allocation4 + $0x1], 1 }
  0xf6   :  { %655 = vsyncpa [#allocation12], 1 }
  0xf7   :  { %657 = vsyncpa [#allocation12 + $0x1], 1 }

// kernel: tpu_custom_call.1
= control target key start
LH: loop header
LB: loop body
LE: loop exit
PB: predicated region body
PF: predicated region fallthrough
CT: control target
= control target key end

     0   :  { %s1521_s0 = inlined_call_operand.hbm [shape: bf16[2,8,32], index: 0, kind: input, shape index: {}]   ;;  %s1522_s1 = inlined_call_operand.hbm [shape: bf16[32,32], index: 1, kind: input, shape index: {}]   ;;  %s1523_s2 = inlined_call_operand.vmem [shape: f32[1,32], index: 2, kind: input, shape index: {}]   ;;  %s1524_s3 = inlined_call_operand.hbm [shape: bf16[32,32], index: 3, kind: input, shape index: {}]   ;;  %s1525_s4 = inlined_call_operand.vmem [shape: f32[1,32], index: 4, kind: input, shape index: {}]   ;;  %s1526_s5 = inlined_call_operand.hbm [shape: bf16[32,32], index: 5, kind: input, shape index: {}]   ;;  %s1527_s6 = inlined_call_operand.vmem [shape: f32[1,32], index: 6, kind: input, shape index: {}]   ;;  %s1528_s7 = inlined_call_operand.hbm [shape: bf16[2,8,32], index: 7, kind: output, shape index: {0}]   ;;  %s1529_s8 = inlined_call_operand.hbm [shape: bf16[2,8,32], index: 8, kind: output, shape index: {1}]   ;;  %s1530_s9 = inlined_call_operand.hbm [shape: bf16[2,8,32], index: 9, kind: output, shape index: {2}]  }
   0x1   :  { %1533 = sst [smem:[#allocation20_spill]] %s1521_s0 }
   0x2   :  { %1534 = sst [smem:[#allocation21_spill]] %s1522_s1 }
   0x3   :  { %1535 = sst [smem:[#allocation22_spill]] %s1523_s2 }
   0x4   :  { %1536 = sst [smem:[#allocation23_spill]] %s1524_s3 }
   0x5   :  { %1537 = sst [smem:[#allocation24_spill]] %s1525_s4 }
   0x6   :  { %1538 = sst [smem:[#allocation25_spill]] %s1526_s5 }
   0x7   :  { %15 = vsyncpa [#allocation3], 0 }
   0x8   :  { %17 = vsyncpa [#allocation3 + $0x1], 0 }
   0x9   :  { %18 = vsyncpa [#allocation6], 0 }
   0xa   :  { %19 = vsyncpa [#allocation9], 0 }
   0xb   :  { %20 = vsyncpa [#allocation4], 0 }
   0xc   :  { %22 = vsyncpa [#allocation4 + $0x1], 0 }
   0xd   :  { %23 = vsyncpa [#allocation12], 0 }
   0xe   :  { %25 = vsyncpa [#allocation12 + $0x1], 0  ;;  %s1276_s30 = smov 0   ;;  %s1278_s10 = smov 0  }
   0xf   :  { %s1280_s11 = smov 0   ;;  %s1282_s12 = smov 0  }
  0x10   :  { %s1284_s13 = smov 0   ;;  %s1286_s14 = smov 0  }
  0x11 LB: > { %s1307_s15 = sadd.s32 4294967295, %s1219_s14   ;;  %p785_p0 = scmp.ge.s32.totalorder %s1219_s14, 1  ;;  %s1219_s14 = sphi %s1286_s14, %s31_s14   ;;  %s1215_s13 = sphi %s1284_s13, %s1558_s13   ;;  %s1211_s12 = sphi %s1282_s12, %s1557_s12   ;;  %s1207_s11 = sphi %s1280_s11, %s1556_s11   ;;  %s1203_s10 = sphi %s1278_s10, %s1555_s10   ;;  %s1199_s30 = sphi %s1276_s30, %s1554_s30  }
  0x12   : > { %p66_p1 = scmp.eq.s32.totalorder %s1307_s15, 0  ;;  %p286_p2 = scmp.lt.s32.totalorder %s1219_s14, 3 }
  0x13   : > { %s1539_s1 = sld [smem:[#allocation21_spill]]  ;;  %s1221_s20 = smov [#allocation5]  }
  0x14   : > { %p1315_p3 = pnand %p785_p0, %p286_p2  ;;  %s299_s21 = sshll.u32 %s1221_s20, 4  ;;  %s300_s21 = int_to_ptr.vmem [resolvable:$true] %s299_s21 }
  0x15   : > { %p789_p6 = scmp.ge.s32.totalorder %s1219_s14, 2  ;;  %s1542_s3 = sld [smem:[#allocation23_spill]] }
  0x16   : > { %p861_p4 = pneg %p1315_p3  ;;  %s1222_s26 = smov 64  }
  0x17   : > { %s1223_s27 = smov 4   ;;  %s1224_s28 = smov [#allocation7]  }
  0x18   : > { %p1323_p5 = pnand %p861_p4, %p66_p1  ;;  %s316_s29 = sshll.u32 %s1224_s28, 4  ;;  %s317_s29 = int_to_ptr.vmem [resolvable:$true] %s316_s29 }
  0x19   : > { %s297_s18 = sshll.u32 %s1539_s1, 4  ;;  %s1543_s5 = sld [smem:[#allocation25_spill]]  ;;  %s298_s18 = int_to_ptr.hbm [resolvable:$true] %s297_s18 }
  0x1a   : > { %864 = dma.hbm_to_vmem [thread:$0]  (!%p1323_p5), %s298_s18, 256, %s300_s21, [#allocation6], %s1222_s26, %s1222_s26, %s1223_s27  }
  0x1b   : > { %s314_s25 = sshll.u32 %s1542_s3, 4  ;;  %s1225_s23 = smov [#allocation8]   ;;  %s315_s25 = int_to_ptr.hbm [resolvable:$true] %s314_s25 }
  0x1c   : > { %867 = dma.hbm_to_vmem [thread:$0]  (!%p1323_p5), %s315_s25, 256, %s317_s29, [#allocation6], %s1222_s26, %s1222_s26, %s1223_s27  }
  0x1d   : > { %s333_s24 = sshll.u32 %s1225_s23, 4  ;;  %s1531_s18 = sadd.s32 4294967294, %s1219_s14   ;;  %s334_s24 = int_to_ptr.vmem [resolvable:$true] %s333_s24 }
  0x1e   : > { %s43_s21 = sadd.s32 1, %s1215_s13  ;;  %s52_s28 = sadd.s32 1, %s1207_s11 }
  0x1f   : > { %s331_s20 = sshll.u32 %s1543_s5, 4  ;;  %p45_p7 = scmp.ge.s32.totalorder %s43_s21, 2  ;;  %s332_s20 = int_to_ptr.hbm [resolvable:$true] %s331_s20 }
  0x20   : > { %870 = dma.hbm_to_vmem [thread:$0]  (!%p1323_p5), %s332_s20, 256, %s334_s24, [#allocation9], %s1222_s26, %s1222_s26, %s1223_s27  }
  0x21   : > { %p59_p8 = scmp.ne.s32.totalorder %s1207_s11, %s1203_s10  ;;  %p60_p9 = scmp.eq.s32.totalorder %s1219_s14, 0 }
  0x22   : > { %p65_p10 = scmp.ne.s32.totalorder %s1203_s10, %s1199_s30  ;;  %s1560_s21 = smov (%p45_p7, %s43_s21), 0 }
  0x23   : > { %1544 = sst [smem:[#allocation19_spill]] %s1560_s21  ;;  %p1350_p11 = por %p60_p9, %p59_p8 }
  0x24   : > { %p1356_p12 = por %p66_p1, %p65_p10  ;;  %s47_s26 = ssub.s32 %s1215_s13, %s1560_s21 }
  0x25   : > { %p217_p13 = scmp.eq.s32.totalorder %s1307_s15, 1  ;;  %p50_p0 = scmp.eq.s32.totalorder %s47_s26, 0 }
  0x26   : > { %p223_p2 = scmp.eq.s32.totalorder %s1531_s18, 1  ;;  %p888_p5 = scmp.lt.s32.totalorder %s1219_s14, 2 }
  0x27   : > { %p1365_p4 = por %p217_p13, %p59_p8  ;;  %s350_s17 = sand.u32 1, %s1207_s11  }
  0x28   : > { %s1371_s29 = scalar_select %p50_p0, %s1207_s11, %s52_s28  }
  0x29   : > { %p1373_p7 = por %p223_p2, %p65_p10  ;;  %s790_s20 = sshll.u32 %s350_s17, 2 }
  0x2a   : > { %s791_s23 = sshll.u32 %s1215_s13, 2  ;;  %s1549_s0 = sld [smem:[#allocation20_spill]] }
  0x2b   : > { %s354_s3 = scalar_lea.vmem [#allocation2], %s790_s20  ;;  %p872_p8 = pnand %p888_p5, %p1350_p11 }
  0x2c   : > { %s363_s18 = sshll.u32 %s354_s3, 4  ;;  %s351_s28 = scalar_lea.sflag [#allocation3], %s350_s17  ;;  %s364_s18 = int_to_ptr.vmem [resolvable:$true] %s363_s18 }
  0x2d   : > { %s1387_s21 = sand.u32 (!%p1315_p3), 1, %s1203_s10  }
  0x2e   : > { %372 = sbr.rel (%p1315_p3) target bundleno = 223 (0xdf), region = 48  ;;  %s1390_s1 = sshll.u32 (!%p1315_p3), %s1387_s21, 2 }
  0x2f   : > { %s375_s3 = scalar_lea.sflag (!%p1315_p3), [#allocation3], %s1387_s21  ;;  %s378_s20 = scalar_lea.vmem (!%p1315_p3), [#allocation2], %s1390_s1 }
  0x30   : > { %s359_s26 = scalar_lea.hbm %s1549_s0, %s791_s23 }
  0x31   : > { %s361_s5 = sshll.u32 %s359_s26, 4  ;;  %s362_s5 = int_to_ptr.hbm [resolvable:$true] %s361_s5 }
  0x32   : > { %874 = dma.hbm_to_vmem [thread:$0]  (!%p872_p8), %s362_s5, 64, %s364_s18, %s351_s28  }
  0x33   : > { %1178 = dma.done.wait (%p1356_p12), %s375_s3, 64  }
  0x34   : > { %1180 = vsyncadd (%p1356_p12), %s375_s3, 4294967232 }
  0x35   : > { %1182 = dma.done.wait (%p66_p1), [#allocation6], 512  }
  0x36   : > { %1184 = vsyncadd (%p66_p1), [#allocation6], 4294966784 }
  0x37   : > { %1186 = dma.done.wait (%p66_p1), [#allocation9], 256  }
  0x38   : > { %1188 = vsyncadd (%p66_p1), [#allocation9], 4294967040  ;;  %v836_v0 = vld [vmem:[#allocation5 + $0x8] sm:$0xff]  ;;  %v838_v1 = vld [vmem:[#allocation7 + $0x8] sm:$0xff]  ;;  %vm461_vm0 = vcmask 261120   ;;  %s1407_s5 = sshll.u32 %s1211_s12, 2 }
  0x39   : > { %v840_v2 = vld [vmem:[#allocation8 + $0x8] sm:$0xff]  ;;  %471 = vmatpush.bf16.msra.mxu0 %v836_v0  ;;  %504 = vmatpush.bf16.msra.mxu1 %v838_v1  ;;  %v835_v3 = vld [vmem:[#allocation5] sm:$0xff]  ;;  %v837_v4 = vld [vmem:[#allocation7] sm:$0xff]  ;;  %s1550_s2 = sld [smem:[#allocation22_spill]]  ;;  %s589_s24 = scalar_lea.hbm %s1529_s8, %s1407_s5  ;;  %vm546_vm1 = vcmask 257024  }
  0x3a   : > { %537 = vmatpush.bf16.msra.mxu2 %v840_v2  ;;  %v839_v5 = vld [vmem:[#allocation8] sm:$0xff]  ;;  %v440_v6 = vld [vmem:[%s378_s20] sm:$0xf]  ;;  %s1551_s4 = sld [smem:[#allocation24_spill]]  ;;  %s557_s26 = sand.u32 1, %s1307_s15  }
  0x3b   : > { %s431_s28 = scalar_lea.vmem [#allocation11], %s1390_s1  ;;  %s574_s19 = scalar_lea.hbm %s1528_s7, %s1407_s5  ;;  %v948_v15 = vld [vmem:[%s1527_s6] ss:$0 sm:$0xff] }
  0x3c   : > { %s1421_s3 = sshll.u32 %s431_s28, 4  ;;  %s1427_s18 = sshll.u32 %s589_s24, 4  ;;  %s592_s3 = int_to_ptr.vmem [resolvable:$true] %s1421_s3  ;;  %s594_s18 = int_to_ptr.hbm [resolvable:$true] %s1427_s18 }
  0x3d   : > { %472 = vmatpush.bf16.msra.mxu0 %v835_v3  ;;  %505 = vmatpush.bf16.msra.mxu1 %v837_v4  ;;  %s424_s25 = scalar_lea.vmem [#allocation10], %s1390_s1  ;;  %s1433_s22 = sshll.u32 %s574_s19, 4  ;;  %s579_s22 = int_to_ptr.hbm [resolvable:$true] %s1433_s22 }
  0x3e   : > { %538 = vmatpush.bf16.msra.mxu2 %v839_v5  ;;  %s1431_s15 = sshll.u32 %s424_s25, 4  ;;  %s604_s20 = scalar_lea.hbm %s1530_s9, %s1407_s5  ;;  %s577_s15 = int_to_ptr.vmem [resolvable:$true] %s1431_s15 }
  0x3f   : > { %v946_v7 = vld [vmem:[%s1550_s2] ss:$0 sm:$0xff]  ;;  %s1446_s0 = scalar_lea.sflag [#allocation12], %s557_s26  ;;  %s1083_s19 = sshra.s32 %s594_s18, 4  ;;  %s1084_s19 = int_to_ptr.hbm [resolvable:$true] %s1083_s19 }
  0x40   : > { %808 = vmatmul.msk.bf16.vlgmr.msra.gmra.mxu0 %vm461_vm0, %v440_v6  ;;  %817 = vmatmul.msk.bf16.vlgmr.msra.gmra.mxu1 %vm461_vm0, %v440_v6  ;;  %v947_v8 = vld [vmem:[%s1551_s4] ss:$0 sm:$0xff]  ;;  %s1085_s2 = scalar_lea.hbm %s1084_s19, 4  ;;  %s1089_s4 = scalar_lea.hbm %s1529_s8, 8 }
  0x41   : > { %826 = vmatmul.msk.bf16.vlgmr.msra.gmra.mxu2 %vm461_vm0, %v440_v6  ;;  %p1086_p1 = scmp.ne.s32.totalorder %s1084_s19, %s1085_s2  ;;  %p1090_p10 = scmp.lt.s32.totalorder %s1084_s19, %s1529_s8 }
  0x42   : > { %p1091_p11 = scmp.lt.s32.totalorder %s1089_s4, %s1085_s2 }
  0x43   : > { %p1087_p3 = pnand %p1086_p1, %p1365_p4 }
  0x44   : > { %p1092_p12 = por %p1091_p11, %p1090_p10 }
  0x45   : > { %p1088_p9 = pneg %p1087_p3 }
  0x47   : > { %p1093_p13 = pnand %p1092_p12, %p1088_p9 }
  0xbd   : > { %v474_v9 = vpop.f32.mrf.mxu0  ;;  %v507_v10 = vpop.f32.mrf.mxu1 }
  0xbe   : > { %v475_v11 = vadd.f32 %v946_v7, %v474_v9  ;;  %v508_v12 = vadd.f32 %v947_v8, %v507_v10 }
  0xc0   : > { %v544_v13 = vmul.f32 0.35355338, %v475_v11  ;;  %v548_v14 = vpack.c.bf16 %v508_v12, %v508_v12 }
  0xc2   : > { %v545_v16 = vpack.c.bf16 %v544_v13, %v544_v13  ;;  %549 = vst.msk [vmem:[%s431_s28] sm:$0xf] %vm546_vm1, %v548_v14 }
  0xc3   : > { %1096 = shalt.err (!%p1093_p13)
}
  0xc4   : > { %856 = dma.vmem_to_hbm [thread:$0]  (%p1365_p4), %s592_s3, 64, %s594_s18, %s1446_s0   ;;  %v540_v17 = vpop.f32.mrf.mxu2  ;;  %547 = vst.msk [vmem:[%s424_s25] sm:$0xf] %vm546_vm1, %v545_v16 }
  0xc5   : > { %s438_s26 = scalar_lea.vmem [#allocation13], %s1390_s1  ;;  %s1463_s12 = sshll.u32 %s604_s20, 4  ;;  %v541_v18 = vadd.f32 %v948_v15, %v540_v17  ;;  %v476_v19 = vpop.f32.mrf.mxu0  ;;  %v509_v20 = vpop.f32.mrf.mxu1  ;;  %s609_s12 = int_to_ptr.hbm [resolvable:$true] %s1463_s12 }
  0xc6   : > { %s1461_s28 = sshll.u32 %s438_s26, 4  ;;  %s553_s2 = scalar_lea.sflag [#allocation4], %s1387_s21  ;;  %s607_s28 = int_to_ptr.vmem [resolvable:$true] %s1461_s28 }
  0xc7   : > { %s1111_s4 = sshra.s32 %s579_s22, 4  ;;  %s1117_s1 = scalar_lea.hbm %s1528_s7, 8  ;;  %s1112_s4 = int_to_ptr.hbm [resolvable:$true] %s1111_s4 }
  0xc8   : > { %s1113_s19 = scalar_lea.hbm %s1112_s4, 4  ;;  %p1118_p8 = scmp.lt.s32.totalorder %s1112_s4, %s1528_s7 }
  0xc9   : > { %p1114_p0 = scmp.ne.s32.totalorder %s1112_s4, %s1113_s19  ;;  %p1119_p1 = scmp.lt.s32.totalorder %s1117_s1, %s1113_s19 }
  0xcb   : > { %p1115_p2 = pnand %p1114_p0, %p1365_p4  ;;  %p1120_p3 = por %p1119_p1, %p1118_p8 }
  0xcd   : > { %p1116_p5 = pneg %p1115_p2 }
  0xcf   : > { %p1121_p9 = pnand %p1120_p3, %p1116_p5 }
  0xd1   : > { %1124 = shalt.err (!%p1121_p9)
}
  0xd2   : > { %855 = dma.vmem_to_hbm [thread:$0]  (%p1365_p4), %s577_s15, 64, %s579_s22, %s553_s2   ;;  %v550_v21 = vpack.c.bf16 %v541_v18, %v541_v18 }
  0xd3   : > { %s1139_s21 = sshra.s32 %s609_s12, 4  ;;  %s1145_s5 = scalar_lea.hbm %s1530_s9, 8  ;;  %s1140_s21 = int_to_ptr.hbm [resolvable:$true] %s1139_s21 }
  0xd4   : > { %551 = vst.msk [vmem:[%s438_s26] sm:$0xf] %vm546_vm1, %v550_v21  ;;  %s1141_s20 = scalar_lea.hbm %s1140_s21, 4  ;;  %p1146_p13 = scmp.lt.s32.totalorder %s1140_s21, %s1530_s9 }
  0xd5   : > { %p1142_p10 = scmp.ne.s32.totalorder %s1140_s21, %s1141_s20  ;;  %p1147_p0 = scmp.lt.s32.totalorder %s1145_s5, %s1141_s20 }
  0xd7   : > { %p1143_p11 = pnand %p1142_p10, %p1365_p4  ;;  %p1148_p2 = por %p1147_p0, %p1146_p13 }
  0xd9   : > { %p1144_p12 = pneg %p1143_p11 }
  0xdb   : > { %p1149_p5 = pnand %p1148_p2, %p1144_p12 }
  0xdd   : > { %1152 = shalt.err (!%p1149_p5)
}
  0xde   : > { %857 = dma.vmem_to_hbm [thread:$0]  (%p1365_p4), %s607_s28, 64, %s609_s12, %s1446_s0   ;;  %v542_v22 = vpop.f32.mrf.mxu2 }
  0xdf PF: > { %s620_s15 = sand.u32 1, %s1199_s30   ;;  %p876_p8 = pnand %p789_p6, %p1373_p7 }
  0xe0   : > { %s621_s22 = scalar_lea.sflag [#allocation4], %s620_s15 }
  0xe1   : > { %p877_p1 = pneg %p876_p8 }
  0xe3   : > { %1190 = dma.done.wait (%p877_p1), %s621_s22, 64  }
  0xe4   : > { %1192 = vsyncadd (%p877_p1), %s621_s22, 4294967232  ;;  %s1552_s26 = sadd.s32 4294967294, %s1219_s14  }
  0xe5   : > { %s630_s2 = sand.u32 1, %s1552_s26  }
  0xe6   : > { %s631_s3 = scalar_lea.sflag [#allocation12], %s630_s2 }
  0xe7   : > { %1194 = dma.done.wait (%p877_p1), %s631_s3, 128  }
  0xe8   : > { %1196 = vsyncadd (%p877_p1), %s631_s3, 4294967168  ;;  %s31_s14 = sadd.s32 1, %s1219_s14   ;;  %s1553_s0 = sld [smem:[#allocation19_spill]] }
  0xe9   : > { %p28_p4 = scmp.ge.s32.totalorder %s31_s14, 4   ;;  %s1554_s30 = smov %s1203_s10 }
  0xea   : > { %s1555_s10 = smov %s1207_s11  ;;  %s1556_s11 = smov %s1371_s29 }
  0xeb   : > { %s1557_s12 = smov %s1215_s13  ;;  %30 = sbr.rel (!%p28_p4) target bundleno = 17 (0x11), region = 137 }
  0xee   : > { %s1558_s13 = smov %s1553_s0 }
  0xf0   :  { %647 = vsyncpa [#allocation3], 1 }
  0xf1   :  { %649 = vsyncpa [#allocation3 + $0x1], 1 }
  0xf2   :  { %650 = vsyncpa [#allocation6], 1 }
  0xf3   :  { %651 = vsyncpa [#allocation9], 1 }
  0xf4   :  { %652 = vsyncpa [#allocation4], 1 }
  0xf5   :  { %654 = vsyncpa [#allocation4 + $0x1], 1 }
  0xf6   :  { %655 = vsyncpa [#allocation12], 1 }
  0xf7   :  { %657 = vsyncpa [#allocation12 + $0x1], 1 }

</bundles_post_ra>
